<compile_context>
chip_gen: v7x
topology: tpu7x:2x2x1
jax: 0.10.0
libtpu: 0.0.40
codegen_flags: <defaults>
</compile_context>

<pallas_src>
import jax
import jax.numpy as jnp
from jax.experimental import pallas as pl
from jax.experimental.pallas import tpu as pltpu

# --- model hyper-parameters (from the reference script) ---
D_K = 3
D_V = 3
D_MODEL = 6
N_HEADS = 2
LN_EPS = 1e-5

TARGET_VOCAB = 5   # {'E','I','eat','meat','S'}
SOURCE_LEN = 4     # encoder_input = [[1, 2, 3, 0]]
TARGET_LEN = 5     # decoder_input = zeros(1, len(target_vocab))

# parameter-slab row layout: [ emb | W_Q | W_K | W_V | gamma | beta ]
_EMB_OFF = 0
_WQ_OFF = _EMB_OFF + TARGET_VOCAB
_WK_OFF = _WQ_OFF + D_MODEL
_WV_OFF = _WK_OFF + D_MODEL
_G_OFF = _WV_OFF + D_MODEL
_B_OFF = _G_OFF + 1
_SLAB_ROWS = _B_OFF + 1          # 25 rows x D_MODEL cols


def decoder_kernel(idx_ref, slab_ref, enc_ref, o_ref):
    """Fused Decoder.forward for one batch element.

    idx_ref : SMEM (B, TARGET_LEN) int32  -- scalar-prefetched token ids
    slab_ref: VMEM (_SLAB_ROWS, D_MODEL)  -- all parameters in one slab
    enc_ref : VMEM (1, SOURCE_LEN, D_MODEL)
    o_ref   : VMEM (1, TARGET_LEN, D_MODEL)
    """
    b = pl.program_id(0)

    slab = slab_ref[...]                                   # (25, 6) f32
    emb = slab[_EMB_OFF:_EMB_OFF + TARGET_VOCAB, :]        # (V, D)
    wq = slab[_WQ_OFF:_WQ_OFF + D_MODEL, :]                # (D, H*d_k)
    wk = slab[_WK_OFF:_WK_OFF + D_MODEL, :]                # (D, H*d_k)
    wv = slab[_WV_OFF:_WV_OFF + D_MODEL, :]                # (D, H*d_v)
    gamma = slab[_G_OFF:_G_OFF + 1, :]                     # (1, D)
    beta = slab[_B_OFF:_B_OFF + 1, :]                      # (1, D)

    # --- embedding lookup: one-hot @ table (no dynamic VMEM indexing) ---
    col_ids = jax.lax.broadcasted_iota(jnp.int32, (1, TARGET_VOCAB), 1)
    onehot_rows = [
        (col_ids == idx_ref[b, t]).astype(jnp.float32) for t in range(TARGET_LEN)
    ]
    onehot = jnp.concatenate(onehot_rows, axis=0)          # (Lt, V)
    dec_emb = jnp.dot(onehot, emb, preferred_element_type=jnp.float32)  # (Lt, D)

    scale = jnp.float32(1.0 / (float(D_K) ** 0.5))

    def mha(x_q, x_kv):
        # combined-head projections: one dot each for Q / K / V
        q_all = jnp.dot(x_q, wq, preferred_element_type=jnp.float32)   # (Lq, H*d_k)
        k_all = jnp.dot(x_kv, wk, preferred_element_type=jnp.float32)  # (Lk, H*d_k)
        v_all = jnp.dot(x_kv, wv, preferred_element_type=jnp.float32)  # (Lk, H*d_v)

        heads = []
        for h in range(N_HEADS):                       # static unroll (2 heads)
            qh = q_all[:, h * D_K:(h + 1) * D_K]       # static lane slices
            kh = k_all[:, h * D_K:(h + 1) * D_K]
            vh = v_all[:, h * D_V:(h + 1) * D_V]

            # scores = Q @ K^T / sqrt(d_k)   (contract last dims, no transpose)
            scores = jax.lax.dot_general(
                qh, kh, (((1,), (1,)), ((), ())),
                preferred_element_type=jnp.float32) * scale            # (Lq, Lk)

            # NOTE: reference's masked_fill is non-in-place & discarded -> no mask.
            scores = scores - jnp.max(scores, axis=-1, keepdims=True)
            e = jnp.exp(scores)
            denom = jnp.sum(e, axis=-1, keepdims=True)
            attn = e * pl.reciprocal(denom, approx=True)               # softmax
            heads.append(jnp.dot(attn, vh, preferred_element_type=jnp.float32))

        # concat heads along features == PyTorch transpose+view
        prob = jnp.concatenate(heads, axis=-1)                         # (Lq, D)

        # residual + LayerNorm (biased variance, eps=1e-5, affine)
        y = x_q + prob
        mean = jnp.mean(y, axis=-1, keepdims=True)
        var = jnp.mean((y - mean) ** 2, axis=-1, keepdims=True)
        return (y - mean) * jax.lax.rsqrt(var + LN_EPS) * gamma + beta

    out1 = mha(dec_emb, dec_emb)          # decoder self-attention
    out2 = mha(out1, enc_ref[0])          # decoder-encoder attention (shared weights)
    o_ref[0] = out2.astype(o_ref.dtype)


def decoder_forward(decoder_input, encoder_input, encoder_output, params):
    """Decoder.forward: embed -> self-attn MHA -> cross-attn MHA, one pallas_call."""
    del encoder_input  # only used for masks in the reference, which are no-ops
    B, Lt = decoder_input.shape
    _, Ls, D = encoder_output.shape
    slab = params["slab"]

    return pl.pallas_call(
        decoder_kernel,
        out_shape=jax.ShapeDtypeStruct((B, Lt, D), jnp.float32),
        grid_spec=pltpu.PrefetchScalarGridSpec(
            num_scalar_prefetch=1,                       # decoder token ids -> SMEM
            grid=(B,),
            in_specs=[
                pl.BlockSpec((_SLAB_ROWS, D_MODEL), lambda b, idx: (0, 0)),
                pl.BlockSpec((1, Ls, D), lambda b, idx: (b, 0, 0)),
            ],
            out_specs=pl.BlockSpec((1, Lt, D), lambda b, idx: (b, 0, 0)),
        ),
        compiler_params=pltpu.CompilerParams(
            dimension_semantics=("parallel",)),
    )(decoder_input.astype(jnp.int32), slab, encoder_output)


# ----------------------- pure-JAX reference for checking -----------------------
def _mha_ref(x_q, x_kv, p):
    B, Lq, _ = x_q.shape
    Lk = x_kv.shape[1]
    Q = (x_q @ p["wq"]).reshape(B, Lq, N_HEADS, D_K).transpose(0, 2, 1, 3)
    K = (x_kv @ p["wk"]).reshape(B, Lk, N_HEADS, D_K).transpose(0, 2, 1, 3)
    V = (x_kv @ p["wv"]).reshape(B, Lk, N_HEADS, D_V).transpose(0, 2, 1, 3)
    scores = jnp.einsum("bhqk,bhsk->bhqs", Q, K) / (float(D_K) ** 0.5)
    attn = jax.nn.softmax(scores, axis=-1)
    prob = jnp.einsum("bhqs,bhsv->bhqv", attn, V)
    prob = prob.transpose(0, 2, 1, 3).reshape(B, Lq, N_HEADS * D_V)
    y = x_q + prob
    mean = jnp.mean(y, axis=-1, keepdims=True)
    var = jnp.mean((y - mean) ** 2, axis=-1, keepdims=True)
    return (y - mean) / jnp.sqrt(var + LN_EPS) * p["gamma"] + p["beta"]


def _decoder_ref(decoder_input, encoder_output, p):
    dec_emb = jnp.take(p["emb"], decoder_input, axis=0)
    out1 = _mha_ref(dec_emb, dec_emb, p)
    return _mha_ref(out1, encoder_output, p)


# ----------------------------------- main ---------------------------------------
def _init_params(key):
    k_emb, k_q, k_k, k_v, k_enc = jax.random.split(key, 5)
    emb = jax.random.normal(k_emb, (TARGET_VOCAB, D_MODEL), jnp.float32)
    # torch nn.Linear(d_model, d_k*n_heads, bias=False) applied as x @ W.T;
    # generate the equivalent (D_in, D_out) matrices directly.
    wq = jax.random.normal(k_q, (D_MODEL, N_HEADS * D_K), jnp.float32) * 0.4
    wk = jax.random.normal(k_k, (D_MODEL, N_HEADS * D_K), jnp.float32) * 0.4
    wv = jax.random.normal(k_v, (D_MODEL, N_HEADS * D_V), jnp.float32) * 0.4
    gamma = jnp.ones((1, D_MODEL), jnp.float32)    # nn.LayerNorm default init
    beta = jnp.zeros((1, D_MODEL), jnp.float32)

    slab = jnp.concatenate([emb, wq, wk, wv, gamma, beta], axis=0)  # (25, 6)
    assert slab.shape == (_SLAB_ROWS, D_MODEL)

    params = {"emb": emb, "wq": wq, "wk": wk, "wv": wv,
              "gamma": gamma, "beta": beta, "slab": slab}
    return params, k_enc


if __name__ == "__main__":
    key = jax.random.PRNGKey(0)
    params, k_enc = _init_params(key)

    # inputs, matching the reference script's shapes
    decoder_input = jnp.zeros((1, TARGET_LEN), jnp.int32)            # (1, 5)
    encoder_input = jnp.array([[1, 2, 3, 0]], jnp.int32)             # (1, 4)
    encoder_output = jax.random.normal(
        k_enc, (1, SOURCE_LEN, D_MODEL), jnp.float32)                # (1, 4, 6)

    out = decoder_forward(decoder_input, encoder_input, encoder_output, params)
    out = jax.block_until_ready(out)

    ref = _decoder_ref(decoder_input, encoder_output, params)
    assert out.shape == (1, TARGET_LEN, D_MODEL), out.shape
    # tolerance allows the intentional approx-reciprocal softmax denominator
    assert jnp.allclose(out, ref, atol=2e-3, rtol=2e-3), (
        "Pallas output diverges from JAX reference")

    print("KERNEL_OK")
</pallas_src>

<mosaic_0001>
module attributes {stable_mosaic.version = 11 : i64} {
  func.func @decoder_kernel(%arg0: i32, %arg1: memref<1x5xi32, #tpu.memory_space<smem>>, %arg2: memref<25x6xf32, #tpu.memory_space<vmem>>, %arg3: memref<1x4x6xf32, #tpu.memory_space<vmem>>, %arg4: memref<1x5x6xf32, #tpu.memory_space<vmem>>) attributes {dimension_semantics = [#tpu.dimension_semantics<parallel>], iteration_bounds = array<i64: 1>, scalar_prefetch = 1 : i64, scratch_operands = 0 : i64, tpu.core_type = #tpu.core_type<tc>, window_params = [{pipeline_mode = #tpu.pipeline_mode<synchronous>, transform_indices = @transform_0, window_bounds = array<i64: 25, 6>}, {transform_indices = @transform_1, window_bounds = array<i64: 1, 4, 6>}, {transform_indices = @transform_2, window_bounds = array<i64: 1, 5, 6>}]} {
    %c0 = arith.constant 0 : index
    %c0_0 = arith.constant 0 : index
    %0 = vector.load %arg2[%c0, %c0_0] : memref<25x6xf32, #tpu.memory_space<vmem>>, vector<25x6xf32>
    %1 = vector.extract_strided_slice %0 {offsets = [0, 0], sizes = [5, 6], strides = [1, 1]} : vector<25x6xf32> to vector<5x6xf32>
    %2 = vector.extract_strided_slice %0 {offsets = [5, 0], sizes = [6, 6], strides = [1, 1]} : vector<25x6xf32> to vector<6x6xf32>
    %3 = vector.extract_strided_slice %0 {offsets = [11, 0], sizes = [6, 6], strides = [1, 1]} : vector<25x6xf32> to vector<6x6xf32>
    %4 = vector.extract_strided_slice %0 {offsets = [17, 0], sizes = [6, 6], strides = [1, 1]} : vector<25x6xf32> to vector<6x6xf32>
    %5 = vector.extract_strided_slice %0 {offsets = [23, 0], sizes = [1, 6], strides = [1, 1]} : vector<25x6xf32> to vector<1x6xf32>
    %6 = vector.extract_strided_slice %0 {offsets = [24, 0], sizes = [1, 6], strides = [1, 1]} : vector<25x6xf32> to vector<1x6xf32>
    %7 = tpu.iota {dimensions = array<i32: 1>} : vector<1x5xi32>
    %8 = arith.index_cast %arg0 : i32 to index
    %c0_1 = arith.constant 0 : index
    %9 = memref.load %arg1[%8, %c0_1] : memref<1x5xi32, #tpu.memory_space<smem>>
    %10 = vector.broadcast %9 : i32 to vector<1x5xi32>
    %11 = arith.cmpi eq, %7, %10 : vector<1x5xi32>
    %12 = arith.extui %11 : vector<1x5xi1> to vector<1x5xi32>
    %13 = arith.sitofp %12 : vector<1x5xi32> to vector<1x5xf32>
    %14 = arith.index_cast %arg0 : i32 to index
    %c1 = arith.constant 1 : index
    %15 = memref.load %arg1[%14, %c1] : memref<1x5xi32, #tpu.memory_space<smem>>
    %16 = vector.broadcast %15 : i32 to vector<1x5xi32>
    %17 = arith.cmpi eq, %7, %16 : vector<1x5xi32>
    %18 = arith.extui %17 : vector<1x5xi1> to vector<1x5xi32>
    %19 = arith.sitofp %18 : vector<1x5xi32> to vector<1x5xf32>
    %20 = arith.index_cast %arg0 : i32 to index
    %c2 = arith.constant 2 : index
    %21 = memref.load %arg1[%20, %c2] : memref<1x5xi32, #tpu.memory_space<smem>>
    %22 = vector.broadcast %21 : i32 to vector<1x5xi32>
    %23 = arith.cmpi eq, %7, %22 : vector<1x5xi32>
    %24 = arith.extui %23 : vector<1x5xi1> to vector<1x5xi32>
    %25 = arith.sitofp %24 : vector<1x5xi32> to vector<1x5xf32>
    %26 = arith.index_cast %arg0 : i32 to index
    %c3 = arith.constant 3 : index
    %27 = memref.load %arg1[%26, %c3] : memref<1x5xi32, #tpu.memory_space<smem>>
    %28 = vector.broadcast %27 : i32 to vector<1x5xi32>
    %29 = arith.cmpi eq, %7, %28 : vector<1x5xi32>
    %30 = arith.extui %29 : vector<1x5xi1> to vector<1x5xi32>
    %31 = arith.sitofp %30 : vector<1x5xi32> to vector<1x5xf32>
    %32 = arith.index_cast %arg0 : i32 to index
    %c4 = arith.constant 4 : index
    %33 = memref.load %arg1[%32, %c4] : memref<1x5xi32, #tpu.memory_space<smem>>
    %34 = vector.broadcast %33 : i32 to vector<1x5xi32>
    %35 = arith.cmpi eq, %7, %34 : vector<1x5xi32>
    %36 = arith.extui %35 : vector<1x5xi1> to vector<1x5xi32>
    %37 = arith.sitofp %36 : vector<1x5xi32> to vector<1x5xf32>
    %38 = tpu.concatenate %13, %19, %25, %31, %37 in 0 : vector<1x5xf32>, vector<1x5xf32>, vector<1x5xf32>, vector<1x5xf32>, vector<1x5xf32> -> vector<5x5xf32>
    %cst = arith.constant dense<0.000000e+00> : vector<5x6xf32>
    %39 = tpu.matmul %38, %1, %cst {dimension_numbers = #tpu.dot_dimension_numbers<[1], [0], [0], [1], [0, 0, 1, 1], [], []>} : vector<5x5xf32>, vector<5x6xf32>, vector<5x6xf32> -> vector<5x6xf32>
    %cst_2 = arith.constant dense<0.000000e+00> : vector<5x6xf32>
    %40 = tpu.matmul %39, %2, %cst_2 {dimension_numbers = #tpu.dot_dimension_numbers<[1], [0], [0], [1], [0, 0, 1, 1], [], []>} : vector<5x6xf32>, vector<6x6xf32>, vector<5x6xf32> -> vector<5x6xf32>
    %cst_3 = arith.constant dense<0.000000e+00> : vector<5x6xf32>
    %41 = tpu.matmul %39, %3, %cst_3 {dimension_numbers = #tpu.dot_dimension_numbers<[1], [0], [0], [1], [0, 0, 1, 1], [], []>} : vector<5x6xf32>, vector<6x6xf32>, vector<5x6xf32> -> vector<5x6xf32>
    %cst_4 = arith.constant dense<0.000000e+00> : vector<5x6xf32>
    %42 = tpu.matmul %39, %4, %cst_4 {dimension_numbers = #tpu.dot_dimension_numbers<[1], [0], [0], [1], [0, 0, 1, 1], [], []>} : vector<5x6xf32>, vector<6x6xf32>, vector<5x6xf32> -> vector<5x6xf32>
    %43 = vector.extract_strided_slice %40 {offsets = [0, 0], sizes = [5, 3], strides = [1, 1]} : vector<5x6xf32> to vector<5x3xf32>
    %44 = vector.extract_strided_slice %41 {offsets = [0, 0], sizes = [5, 3], strides = [1, 1]} : vector<5x6xf32> to vector<5x3xf32>
    %45 = vector.extract_strided_slice %42 {offsets = [0, 0], sizes = [5, 3], strides = [1, 1]} : vector<5x6xf32> to vector<5x3xf32>
    %cst_5 = arith.constant dense<0.000000e+00> : vector<5x5xf32>
    %46 = tpu.matmul %43, %44, %cst_5 {dimension_numbers = #tpu.dot_dimension_numbers<[1], [1], [0], [0], [0, 0, 1, 0], [], []>} : vector<5x3xf32>, vector<5x3xf32>, vector<5x5xf32> -> vector<5x5xf32>
    %cst_6 = arith.constant 0.577350259 : f32
    %47 = vector.broadcast %cst_6 : f32 to vector<5x5xf32>
    %48 = arith.mulf %46, %47 : vector<5x5xf32>
    %cst_7 = arith.constant dense<0xFF800000> : vector<5xf32>
    %49 = vector.multi_reduction <maximumf>, %48, %cst_7 [1] : vector<5x5xf32> to vector<5xf32>
    %50 = vector.shape_cast %49 : vector<5xf32> to vector<5x1xf32>
    %51 = vector.broadcast %50 : vector<5x1xf32> to vector<5x5xf32>
    %52 = arith.subf %48, %51 : vector<5x5xf32>
    %53 = math.exp %52 : vector<5x5xf32>
    %cst_8 = arith.constant dense<0.000000e+00> : vector<5xf32>
    %54 = vector.multi_reduction <add>, %53, %cst_8 [1] : vector<5x5xf32> to vector<5xf32>
    %55 = vector.shape_cast %54 : vector<5xf32> to vector<5x1xf32>
    %56 = tpu.reciprocal %55 {approx = true} : vector<5x1xf32> -> vector<5x1xf32>
    %57 = vector.broadcast %56 : vector<5x1xf32> to vector<5x5xf32>
    %58 = arith.mulf %53, %57 : vector<5x5xf32>
    %cst_9 = arith.constant dense<0.000000e+00> : vector<5x3xf32>
    %59 = tpu.matmul %58, %45, %cst_9 {dimension_numbers = #tpu.dot_dimension_numbers<[1], [0], [0], [1], [0, 0, 1, 1], [], []>} : vector<5x5xf32>, vector<5x3xf32>, vector<5x3xf32> -> vector<5x3xf32>
    %60 = vector.extract_strided_slice %40 {offsets = [0, 3], sizes = [5, 3], strides = [1, 1]} : vector<5x6xf32> to vector<5x3xf32>
    %61 = vector.extract_strided_slice %41 {offsets = [0, 3], sizes = [5, 3], strides = [1, 1]} : vector<5x6xf32> to vector<5x3xf32>
    %62 = vector.extract_strided_slice %42 {offsets = [0, 3], sizes = [5, 3], strides = [1, 1]} : vector<5x6xf32> to vector<5x3xf32>
    %cst_10 = arith.constant dense<0.000000e+00> : vector<5x5xf32>
    %63 = tpu.matmul %60, %61, %cst_10 {dimension_numbers = #tpu.dot_dimension_numbers<[1], [1], [0], [0], [0, 0, 1, 0], [], []>} : vector<5x3xf32>, vector<5x3xf32>, vector<5x5xf32> -> vector<5x5xf32>
    %cst_11 = arith.constant 0.577350259 : f32
    %64 = vector.broadcast %cst_11 : f32 to vector<5x5xf32>
    %65 = arith.mulf %63, %64 : vector<5x5xf32>
    %cst_12 = arith.constant dense<0xFF800000> : vector<5xf32>
    %66 = vector.multi_reduction <maximumf>, %65, %cst_12 [1] : vector<5x5xf32> to vector<5xf32>
    %67 = vector.shape_cast %66 : vector<5xf32> to vector<5x1xf32>
    %68 = vector.broadcast %67 : vector<5x1xf32> to vector<5x5xf32>
    %69 = arith.subf %65, %68 : vector<5x5xf32>
    %70 = math.exp %69 : vector<5x5xf32>
    %cst_13 = arith.constant dense<0.000000e+00> : vector<5xf32>
    %71 = vector.multi_reduction <add>, %70, %cst_13 [1] : vector<5x5xf32> to vector<5xf32>
    %72 = vector.shape_cast %71 : vector<5xf32> to vector<5x1xf32>
    %73 = tpu.reciprocal %72 {approx = true} : vector<5x1xf32> -> vector<5x1xf32>
    %74 = vector.broadcast %73 : vector<5x1xf32> to vector<5x5xf32>
    %75 = arith.mulf %70, %74 : vector<5x5xf32>
    %cst_14 = arith.constant dense<0.000000e+00> : vector<5x3xf32>
    %76 = tpu.matmul %75, %62, %cst_14 {dimension_numbers = #tpu.dot_dimension_numbers<[1], [0], [0], [1], [0, 0, 1, 1], [], []>} : vector<5x5xf32>, vector<5x3xf32>, vector<5x3xf32> -> vector<5x3xf32>
    %77 = tpu.concatenate %59, %76 in 1 : vector<5x3xf32>, vector<5x3xf32> -> vector<5x6xf32>
    %78 = arith.addf %39, %77 : vector<5x6xf32>
    %cst_15 = arith.constant dense<0.000000e+00> : vector<5xf32>
    %79 = vector.multi_reduction <add>, %78, %cst_15 [1] : vector<5x6xf32> to vector<5xf32>
    %80 = vector.shape_cast %79 : vector<5xf32> to vector<5x1xf32>
    %cst_16 = arith.constant 6.000000e+00 : f32
    %81 = vector.broadcast %cst_16 : f32 to vector<5x1xf32>
    %82 = arith.divf %80, %81 : vector<5x1xf32>
    %83 = vector.broadcast %82 : vector<5x1xf32> to vector<5x6xf32>
    %84 = arith.subf %78, %83 : vector<5x6xf32>
    %85 = arith.mulf %84, %84 : vector<5x6xf32>
    %cst_17 = arith.constant dense<0.000000e+00> : vector<5xf32>
    %86 = vector.multi_reduction <add>, %85, %cst_17 [1] : vector<5x6xf32> to vector<5xf32>
    %87 = vector.shape_cast %86 : vector<5xf32> to vector<5x1xf32>
    %cst_18 = arith.constant 6.000000e+00 : f32
    %88 = vector.broadcast %cst_18 : f32 to vector<5x1xf32>
    %89 = arith.divf %87, %88 : vector<5x1xf32>
    %90 = vector.broadcast %82 : vector<5x1xf32> to vector<5x6xf32>
    %91 = arith.subf %78, %90 : vector<5x6xf32>
    %cst_19 = arith.constant 9.99999974E-6 : f32
    %92 = vector.broadcast %cst_19 : f32 to vector<5x1xf32>
    %93 = arith.addf %89, %92 : vector<5x1xf32>
    %94 = math.rsqrt %93 : vector<5x1xf32>
    %95 = vector.broadcast %94 : vector<5x1xf32> to vector<5x6xf32>
    %96 = arith.mulf %91, %95 : vector<5x6xf32>
    %97 = vector.broadcast %5 : vector<1x6xf32> to vector<5x6xf32>
    %98 = arith.mulf %96, %97 : vector<5x6xf32>
    %99 = vector.broadcast %6 : vector<1x6xf32> to vector<5x6xf32>
    %100 = arith.addf %98, %99 : vector<5x6xf32>
    %c0_20 = arith.constant 0 : index
    %c0_21 = arith.constant 0 : index
    %c0_22 = arith.constant 0 : index
    %101 = vector.load %arg3[%c0_20, %c0_21, %c0_22] : memref<1x4x6xf32, #tpu.memory_space<vmem>>, vector<1x4x6xf32>
    %102 = vector.shape_cast %101 : vector<1x4x6xf32> to vector<4x6xf32>
    %cst_23 = arith.constant dense<0.000000e+00> : vector<5x6xf32>
    %103 = tpu.matmul %100, %2, %cst_23 {dimension_numbers = #tpu.dot_dimension_numbers<[1], [0], [0], [1], [0, 0, 1, 1], [], []>} : vector<5x6xf32>, vector<6x6xf32>, vector<5x6xf32> -> vector<5x6xf32>
    %cst_24 = arith.constant dense<0.000000e+00> : vector<4x6xf32>
    %104 = tpu.matmul %102, %3, %cst_24 {dimension_numbers = #tpu.dot_dimension_numbers<[1], [0], [0], [1], [0, 0, 1, 1], [], []>} : vector<4x6xf32>, vector<6x6xf32>, vector<4x6xf32> -> vector<4x6xf32>
    %cst_25 = arith.constant dense<0.000000e+00> : vector<4x6xf32>
    %105 = tpu.matmul %102, %4, %cst_25 {dimension_numbers = #tpu.dot_dimension_numbers<[1], [0], [0], [1], [0, 0, 1, 1], [], []>} : vector<4x6xf32>, vector<6x6xf32>, vector<4x6xf32> -> vector<4x6xf32>
    %106 = vector.extract_strided_slice %103 {offsets = [0, 0], sizes = [5, 3], strides = [1, 1]} : vector<5x6xf32> to vector<5x3xf32>
    %107 = vector.extract_strided_slice %104 {offsets = [0, 0], sizes = [4, 3], strides = [1, 1]} : vector<4x6xf32> to vector<4x3xf32>
    %108 = vector.extract_strided_slice %105 {offsets = [0, 0], sizes = [4, 3], strides = [1, 1]} : vector<4x6xf32> to vector<4x3xf32>
    %cst_26 = arith.constant dense<0.000000e+00> : vector<5x4xf32>
    %109 = tpu.matmul %106, %107, %cst_26 {dimension_numbers = #tpu.dot_dimension_numbers<[1], [1], [0], [0], [0, 0, 1, 0], [], []>} : vector<5x3xf32>, vector<4x3xf32>, vector<5x4xf32> -> vector<5x4xf32>
    %cst_27 = arith.constant 0.577350259 : f32
    %110 = vector.broadcast %cst_27 : f32 to vector<5x4xf32>
    %111 = arith.mulf %109, %110 : vector<5x4xf32>
    %cst_28 = arith.constant dense<0xFF800000> : vector<5xf32>
    %112 = vector.multi_reduction <maximumf>, %111, %cst_28 [1] : vector<5x4xf32> to vector<5xf32>
    %113 = vector.shape_cast %112 : vector<5xf32> to vector<5x1xf32>
    %114 = vector.broadcast %113 : vector<5x1xf32> to vector<5x4xf32>
    %115 = arith.subf %111, %114 : vector<5x4xf32>
    %116 = math.exp %115 : vector<5x4xf32>
    %cst_29 = arith.constant dense<0.000000e+00> : vector<5xf32>
    %117 = vector.multi_reduction <add>, %116, %cst_29 [1] : vector<5x4xf32> to vector<5xf32>
    %118 = vector.shape_cast %117 : vector<5xf32> to vector<5x1xf32>
    %119 = tpu.reciprocal %118 {approx = true} : vector<5x1xf32> -> vector<5x1xf32>
    %120 = vector.broadcast %119 : vector<5x1xf32> to vector<5x4xf32>
    %121 = arith.mulf %116, %120 : vector<5x4xf32>
    %cst_30 = arith.constant dense<0.000000e+00> : vector<5x3xf32>
    %122 = tpu.matmul %121, %108, %cst_30 {dimension_numbers = #tpu.dot_dimension_numbers<[1], [0], [0], [1], [0, 0, 1, 1], [], []>} : vector<5x4xf32>, vector<4x3xf32>, vector<5x3xf32> -> vector<5x3xf32>
    %123 = vector.extract_strided_slice %103 {offsets = [0, 3], sizes = [5, 3], strides = [1, 1]} : vector<5x6xf32> to vector<5x3xf32>
    %124 = vector.extract_strided_slice %104 {offsets = [0, 3], sizes = [4, 3], strides = [1, 1]} : vector<4x6xf32> to vector<4x3xf32>
    %125 = vector.extract_strided_slice %105 {offsets = [0, 3], sizes = [4, 3], strides = [1, 1]} : vector<4x6xf32> to vector<4x3xf32>
    %cst_31 = arith.constant dense<0.000000e+00> : vector<5x4xf32>
    %126 = tpu.matmul %123, %124, %cst_31 {dimension_numbers = #tpu.dot_dimension_numbers<[1], [1], [0], [0], [0, 0, 1, 0], [], []>} : vector<5x3xf32>, vector<4x3xf32>, vector<5x4xf32> -> vector<5x4xf32>
    %cst_32 = arith.constant 0.577350259 : f32
    %127 = vector.broadcast %cst_32 : f32 to vector<5x4xf32>
    %128 = arith.mulf %126, %127 : vector<5x4xf32>
    %cst_33 = arith.constant dense<0xFF800000> : vector<5xf32>
    %129 = vector.multi_reduction <maximumf>, %128, %cst_33 [1] : vector<5x4xf32> to vector<5xf32>
    %130 = vector.shape_cast %129 : vector<5xf32> to vector<5x1xf32>
    %131 = vector.broadcast %130 : vector<5x1xf32> to vector<5x4xf32>
    %132 = arith.subf %128, %131 : vector<5x4xf32>
    %133 = math.exp %132 : vector<5x4xf32>
    %cst_34 = arith.constant dense<0.000000e+00> : vector<5xf32>
    %134 = vector.multi_reduction <add>, %133, %cst_34 [1] : vector<5x4xf32> to vector<5xf32>
    %135 = vector.shape_cast %134 : vector<5xf32> to vector<5x1xf32>
    %136 = tpu.reciprocal %135 {approx = true} : vector<5x1xf32> -> vector<5x1xf32>
    %137 = vector.broadcast %136 : vector<5x1xf32> to vector<5x4xf32>
    %138 = arith.mulf %133, %137 : vector<5x4xf32>
    %cst_35 = arith.constant dense<0.000000e+00> : vector<5x3xf32>
    %139 = tpu.matmul %138, %125, %cst_35 {dimension_numbers = #tpu.dot_dimension_numbers<[1], [0], [0], [1], [0, 0, 1, 1], [], []>} : vector<5x4xf32>, vector<4x3xf32>, vector<5x3xf32> -> vector<5x3xf32>
    %140 = tpu.concatenate %122, %139 in 1 : vector<5x3xf32>, vector<5x3xf32> -> vector<5x6xf32>
    %141 = arith.addf %100, %140 : vector<5x6xf32>
    %cst_36 = arith.constant dense<0.000000e+00> : vector<5xf32>
    %142 = vector.multi_reduction <add>, %141, %cst_36 [1] : vector<5x6xf32> to vector<5xf32>
    %143 = vector.shape_cast %142 : vector<5xf32> to vector<5x1xf32>
    %cst_37 = arith.constant 6.000000e+00 : f32
    %144 = vector.broadcast %cst_37 : f32 to vector<5x1xf32>
    %145 = arith.divf %143, %144 : vector<5x1xf32>
    %146 = vector.broadcast %145 : vector<5x1xf32> to vector<5x6xf32>
    %147 = arith.subf %141, %146 : vector<5x6xf32>
    %148 = arith.mulf %147, %147 : vector<5x6xf32>
    %cst_38 = arith.constant dense<0.000000e+00> : vector<5xf32>
    %149 = vector.multi_reduction <add>, %148, %cst_38 [1] : vector<5x6xf32> to vector<5xf32>
    %150 = vector.shape_cast %149 : vector<5xf32> to vector<5x1xf32>
    %cst_39 = arith.constant 6.000000e+00 : f32
    %151 = vector.broadcast %cst_39 : f32 to vector<5x1xf32>
    %152 = arith.divf %150, %151 : vector<5x1xf32>
    %153 = vector.broadcast %145 : vector<5x1xf32> to vector<5x6xf32>
    %154 = arith.subf %141, %153 : vector<5x6xf32>
    %cst_40 = arith.constant 9.99999974E-6 : f32
    %155 = vector.broadcast %cst_40 : f32 to vector<5x1xf32>
    %156 = arith.addf %152, %155 : vector<5x1xf32>
    %157 = math.rsqrt %156 : vector<5x1xf32>
    %158 = vector.broadcast %157 : vector<5x1xf32> to vector<5x6xf32>
    %159 = arith.mulf %154, %158 : vector<5x6xf32>
    %160 = vector.broadcast %5 : vector<1x6xf32> to vector<5x6xf32>
    %161 = arith.mulf %159, %160 : vector<5x6xf32>
    %162 = vector.broadcast %6 : vector<1x6xf32> to vector<5x6xf32>
    %163 = arith.addf %161, %162 : vector<5x6xf32>
    %c0_41 = arith.constant 0 : index
    %c0_42 = arith.constant 0 : index
    %c0_43 = arith.constant 0 : index
    %164 = vector.load %arg4[%c0_41, %c0_42, %c0_43] : memref<1x5x6xf32, #tpu.memory_space<vmem>>, vector<1x5x6xf32>
    %165 = vector.shape_cast %164 : vector<1x5x6xf32> to vector<5x6xf32>
    %166 = vector.shape_cast %163 : vector<5x6xf32> to vector<1x5x6xf32>
    tpu.vector_store %arg4[%c0_41, %c0_42, %c0_43], %166 {strides = array<i32>} : memref<1x5x6xf32, #tpu.memory_space<vmem>>, vector<1x5x6xf32>,
    return
  }
  func.func @transform_0(%arg0: i32, %arg1: memref<1x5xi32, #tpu.memory_space<smem>>) -> (i32, i32) {
    %c0_i32 = arith.constant 0 : i32
    %c0_i32_0 = arith.constant 0 : i32
    %c0_i32_1 = arith.constant 0 : i32
    return %c0_i32, %c0_i32_0 : i32, i32
  }
  func.func @transform_1(%arg0: i32, %arg1: memref<1x5xi32, #tpu.memory_space<smem>>) -> (i32, i32, i32) {
    %c0_i32 = arith.constant 0 : i32
    %c0_i32_0 = arith.constant 0 : i32
    %c0_i32_1 = arith.constant 0 : i32
    return %arg0, %c0_i32, %c0_i32_0 : i32, i32, i32
  }
  func.func @transform_2(%arg0: i32, %arg1: memref<1x5xi32, #tpu.memory_space<smem>>) -> (i32, i32, i32) {
    %c0_i32 = arith.constant 0 : i32
    %c0_i32_0 = arith.constant 0 : i32
    %c0_i32_1 = arith.constant 0 : i32
    return %arg0, %c0_i32, %c0_i32_0 : i32, i32, i32
  }
}

</mosaic_0001>

<bundles_post_ra>
// kernel: tpu_custom_call.1
= control target key start
LH: loop header
LB: loop body
LE: loop exit
PB: predicated region body
PF: predicated region fallthrough
CT: control target
= control target key end

     0   :  { %s1680_s0 = inlined_call_operand.vmem [shape: s32[1,5], index: 0, kind: input, shape index: {}]   ;;  %s1681_s1 = inlined_call_operand.vmem [shape: f32[25,6], index: 1, kind: input, shape index: {}]   ;;  %s1682_s2 = inlined_call_operand.vmem [shape: f32[1,4,6], index: 2, kind: input, shape index: {}]   ;;  %s1683_s3 = inlined_call_operand.vmem [shape: f32[1,5,6], index: 3, kind: output, shape index: {}]  }
   0x1   :  { %s8_s14 = sshll.u32 %s1680_s0, 4  ;;  %s9_s14 = int_to_ptr.vmem [resolvable:$true] %s8_s14 }
   0x2   :  { %s1480_s15 = scalar_lea.vmem %s9_s14, 16  ;;  %p1485_p1 = scmp.lt.s32.totalorder %s9_s14, %s9_s14 }
   0x3   :  { %p1481_p0 = scmp.ne.s32.totalorder %s9_s14, %s1480_s15  ;;  %p1486_p2 = scmp.lt.s32.totalorder %s1480_s15, %s1480_s15 }
   0x5   :  { %p1487_p3 = por %p1486_p2, %p1485_p1 }
   0x7   :  { %p1488_p4 = pnand %p1487_p3, %p1481_p0 }
   0x9   :  { %1491 = shalt.err (!%p1488_p4)  }
   0xa   :  { %s1494_s16 = smov [#allocation3]  }
   0xb   :  { %11 = dma.vmem_to_smem %s9_s14, 16, %s1494_s16, [#allocation2] }
   0xc   :  { %1492 = dma.done.wait [#allocation2], 16 }
   0xd   :  { %1493 = vsyncadd [#allocation2], 4294967280 }
   0xe   :  { %13 = sfence }
   0xf   :  { %v18_v0 = vld [vmem:[%s1681_s1] sm:$0xff]  ;;  %vm66_vm0 = vcmask 1044480   ;;  %v22_v1 = vlaneseq  ;;  %s25_s0 = sld [smem:[#allocation3]]  ;;  %v1495_v2 = vmov 0.0   ;;  %vm1496_vm1 = vmmov 0   ;;  %s1311_s19 = sld [smem:[#allocation3 + $0x1]] }
  0x10   :  { %1380 = vmatprep.subr.mxu0 %v1495_v2  ;;  %1382 = vmatprep.mubr.msk.f32.mxu0 %vm1496_vm1, %v1495_v2  ;;  %s1313_s20 = sld [smem:[#allocation3 + $0x2]]  ;;  %s1315_s21 = sld [smem:[#allocation3 + $0x3]]  ;;  %v19_v4 = vld [vmem:[%s1681_s1 + $0x8] sm:$0xff]  ;;  %v1540_v5 = vld [vmem:[%s1681_s1 + $0x10] sm:$0xff]  ;;  %vm54_vm2 = vcmask 1040384   ;;  %vm56_vm3 = vcmask 1041408  }
  0x11   :  { %1381 = vmatpush3.msk.msra.mxu0 %vm66_vm0, %v18_v0  ;;  %s1317_s22 = sld [smem:[#allocation3 + $0x4]]  ;;  %1385 = vmatprep.subr.mxu1 %v1495_v2  ;;  %v23_v3 = vand.u32 127, %v22_v1  ;;  %vm58_vm4 = vcmask 1042432   ;;  %v222_v7 = vrot.slane %v19_v4, 3  ;;  %v223_v10 = vrot.slane %v1540_v5, 3  ;;  %s1497_s27 = smov 125  }
  0x12   :  { %1390 = vmatprep.subr.mxu0 %v1495_v2  ;;  %1387 = vmatprep.mubr.msk.f32.mxu1 %vm1496_vm1, %v1495_v2  ;;  %vm60_vm10 = vcmask 1043456   ;;  %vm62_vm11 = vcmask 39936   ;;  %vm148_vm12 = vcmask 1045504   ;;  %v141_v23 = vrot.slane %v18_v0, 5  ;;  %s1498_s28 = smov 3  }
  0x13   :  { %v1552_v21 = vsel %vm66_vm0, %v222_v7, %v223_v10  ;;  %v142_v24 = vrot.slane %v19_v4, 5  ;;  %vm144_vm13 = vcmask 48128   ;;  %v297_v26 = vrot.slane %v1540_v5, 1 }
  0x14   :  { %vm370_vm14 = vcmask 23552   ;;  %vm448_vm15 = vcmask 36864  }
  0x15   :  { %v26_v6 = vstv %s25_s0  ;;  %v32_v8 = vstv %s1311_s19  ;;  %v143_v25 = vsel %vm58_vm4, %v141_v23, %v142_v24  ;;  %v1633_v23 = vld [vmem:[%s1681_s1 + $0x18] ss:$0 sm:$0xff] }
  0x16   :  { %vm27_vm5 = vcmp.eq.s32.totalorder %v23_v3, %v26_v6  ;;  %v38_v9 = vstv %s1313_s20  ;;  %vm33_vm6 = vcmp.eq.s32.totalorder %v23_v3, %v32_v8  ;;  %v44_v12 = vstv %s1315_s21  ;;  %1386 = vmatpush3.msk.msra.mxu1 %vm148_vm12, %v143_v25 }
  0x17   :  { %v1310_v11 = vsel %vm27_vm5, 1.0, %v1495_v2  ;;  %vm39_vm7 = vcmp.eq.s32.totalorder %v23_v3, %v38_v9  ;;  %v1312_v13 = vsel %vm33_vm6, 1.0, %v1495_v2  ;;  %vm45_vm8 = vcmp.eq.s32.totalorder %v23_v3, %v44_v12  ;;  %1395 = vmatprep.subr.mxu1 %v1495_v2 }
  0x18   :  { %v1314_v14 = vsel %vm39_vm7, 1.0, %v1495_v2  ;;  %v50_v15 = vstv %s1317_s22  ;;  %v1316_v16 = vsel %vm45_vm8, 1.0, %v1495_v2  ;;  %v55_v17 = vsel %vm54_vm2, %v1310_v11, %v1312_v13 }
  0x19   :  { %vm51_vm9 = vcmp.eq.s32.totalorder %v23_v3, %v50_v15  ;;  %v57_v19 = vsel %vm56_vm3, %v55_v17, %v1314_v14  ;;  %v734_v14 = vld [vmem:[%s1682_s2] sm:$0xf]  ;;  %vm1028_vm2 = vcmask 28672   ;;  %vm1040_vm3 = vcmask 31744  }
  0x1a   :  { %v1318_v18 = vsel %vm51_vm9, 1.0, %v1495_v2  ;;  %v59_v20 = vsel %vm58_vm4, %v57_v19, %v1316_v16 }
  0x1b   :  { %v61_v22 = vsel %vm60_vm10, %v59_v20, %v1318_v18  ;;  %v725_v18 = vshrl.u32 %v22_v1, 7 }
  0x1c   :  { %1383 = vmatmul.mubr.msk.f32.vlgmr.msra.gmra.mrb[0].mxu0 %vm62_vm11, %v61_v22 }
  0x1d   :  { %1391 = vmatpush3.msk.msra.mxu0 %vm148_vm12, %v1552_v21  ;;  %1392 = vmatprep.mubr.msk.f32.mxu0 %vm1496_vm1, %v1495_v2  ;;  %v726_v19 = vsub.s32 7, %v725_v18 }
  0x1e   :  { %1400 = vmatprep.subr.mxu0 %v1495_v2 }
  0x1f   :  { %v1628_v20 = vrot.slane %v1540_v5, %v726_v19 }
  0xef   :  { %v1565_v27 = vpop.f32.mrb[0].mxu0 }
  0xf0   :  { %v1384_v28 = vpop.f32.mrb[1].mxu0  ;;  %1388 = vmatmul.mubr.msk.f32.vlgmr.msra.gmra.mrb[0].mxu1 %vm144_vm13, %v1565_v27  ;;  %1393 = vmatmul.mubr.msk.f32.vlgmr.msra.gmra.mrb[2].mxu0 %vm144_vm13, %v1565_v27 }
  0xf1   :  { %1396 = vmatpush3.msk.msra.mxu1 %vm148_vm12, %v297_v26  ;;  %1397 = vmatprep.mubr.msk.f32.mxu1 %vm1496_vm1, %v1495_v2 }
  0xf2   :  { %1402 = vmatprep.mubr.msk.f32.mxu0 %vm1496_vm1, %v1495_v2  ;;  %1405 = vmatprep.subr.mxu1 %v1495_v2 }
  0xf4   :  { %1398 = vmatmul.mubr.msk.f32.vlgmr.msra.gmra.mrb[2].mxu1 %vm144_vm13, %v1565_v27 }
  0xf5   :  { %1407 = vmatprep.mubr.msk.f32.mxu1 %vm1496_vm1, %v1495_v2 }
 0x1c3   :  { %v217_v29 = vpop.f32.mrb[0].mxu1  ;;  %v293_v30 = vpop.f32.mrb[2].mxu0 }
 0x1c4   :  { %v1389_v31 = vpop.f32.mrb[1].mxu1  ;;  %538 = vrot.lane.b32.xlu0 %v293_v30, %s1497_s27  ;;  %v1394_v32 = vpop.f32.mrb[3].mxu0  ;;  %1401 = vmatpush3.xpose.msk.msra.mxu0 %vm370_vm14, %v293_v30 }
 0x1c5   :  { %1410 = vmatprep.subr.mxu0 %v1495_v2 }
 0x1c7   :  { %v366_v33 = vpop.f32.mrb[2].mxu1  ;;  %1403 = vmatmul.mubr.msk.f32.vlgmr.msra.gmra.mrb[4].mxu0 %vm370_vm14, %v217_v29 }
 0x1c8   :  { %v1399_v34 = vpop.f32.mrb[3].mxu1  ;;  %1406 = vmatpush3.msk.msra.mxu1 %vm66_vm0, %v366_v33  ;;  %536 = vrot.lane.b32.xlu0 %v217_v29, %s1497_s27 }
 0x1c9   :  { %1412 = vmatprep.mubr.msk.f32.mxu0 %vm1496_vm1, %v1495_v2  ;;  %1415 = vmatprep.subr.mxu1 %v1495_v2 }
 0x236   :  { %v539_v35 = vpop.permute.xlu0 %538 }
 0x237   :  { %1411 = vmatpush3.xpose.msk.msra.mxu0 %vm370_vm14, %v539_v35 }
 0x238   :  { %1420 = vmatprep.subr.mxu0 %v1495_v2 }
 0x23a   :  { %v537_v36 = vpop.permute.xlu0 %536 }
 0x23b   :  { %1413 = vmatmul.mubr.msk.f32.vlgmr.msra.gmra.mrb[6].mxu0 %vm370_vm14, %v537_v36 }
 0x23c   :  { %1421 = vmatpush3.msk.msra.mxu0 %vm148_vm12, %v143_v25  ;;  %1422 = vmatprep.mubr.msk.f32.mxu0 %vm1496_vm1, %v1495_v2 }
 0x23d   :  { %1430 = vmatprep.subr.mxu0 %v1495_v2 }
 0x29a   :  { %v443_v37 = vpop.f32.mrb[4].mxu0 }
 0x29b   :  { %v447_v38 = vmul.f32 0.57735026, %v443_v37  ;;  %v1404_v39 = vpop.f32.mrb[5].mxu0 }
 0x29d   :  { %v449_v40 = vsel %vm448_vm15, %v447_v38, -inf }
 0x29e   :  { %450 = vmax.xlane.f32.xlu1 %v449_v40 }
 0x30e   :  { %v610_v41 = vpop.f32.mrb[6].mxu0 }
 0x30f   :  { %v614_v42 = vmul.f32 0.57735026, %v610_v41  ;;  %v1414_v43 = vpop.f32.mrb[7].mxu0 }
 0x311   :  { %v615_v44 = vsel %vm448_vm15, %v614_v42, -inf }
 0x312   :  { %616 = vmax.xlane.f32.xlu1 %v615_v44 }
 0x32b   :  { %v451_v45 = vpop.xlane.xlu1 %450 }
 0x32c   :  { %v452_v46 = vsub.f32 %v447_v38, %v451_v45 }
 0x32e   :  { %v453_v47 = vmul.f32 1.442695, %v452_v46 }
 0x330   :  { %1460 = vpow2.f32 %v453_v47 }
 0x33a   :  { %v1461_v48 = vpop.eup %1460 }
 0x33b   :  { %v455_v49 = vsel %vm448_vm15, %v1461_v48, 0.0 }
 0x33c   :  { %456 = vadd.xlane.f32.xlu0 %v455_v49 }
 0x39f   :  { %v617_v50 = vpop.xlane.xlu1 %616 }
 0x3a0   :  { %v618_v51 = vsub.f32 %v614_v42, %v617_v50 }
 0x3a2   :  { %v619_v52 = vmul.f32 1.442695, %v618_v51 }
 0x3a4   :  { %1462 = vpow2.f32 %v619_v52 }
 0x3ae   :  { %v1463_v53 = vpop.eup %1462 }
 0x3af   :  { %v621_v54 = vsel %vm448_vm15, %v1463_v53, 0.0 }
 0x3b0   :  { %622 = vadd.xlane.f32.xlu1 %v621_v54 }
 0x3c1   :  { %626 = vrot.lane.b32.xlu1 %v366_v33, %s1497_s27 }
 0x3c9   :  { %v457_v55 = vpop.xlane.xlu0 %456 }
 0x3ca   :  { %1464 = vrcp.f32 %v457_v55 }
 0x3d4   :  { %v1465_v56 = vpop.eup %1464 }
 0x3d5   :  { %v459_v57 = vmul.f32 %v1465_v56, %v1461_v48 }
 0x3d7   :  { %1408 = vmatmul.mubr.msk.f32.vlgmr.msra.gmra.mrb[4].mxu1 %vm62_vm11, %v459_v57 }
 0x3d8   :  { %1417 = vmatprep.mubr.msk.f32.mxu1 %vm1496_vm1, %v1495_v2 }
 0x43d   :  { %v623_v58 = vpop.xlane.xlu1 %622 }
 0x43e   :  { %1466 = vrcp.f32 %v623_v58 }
 0x441   :  { %v627_v59 = vpop.permute.xlu1 %626 }
 0x442   :  { %1416 = vmatpush3.msk.msra.mxu1 %vm66_vm0, %v627_v59  ;;  %vm709_vm0 = vcmask 45056  }
 0x443   :  { %1425 = vmatprep.subr.mxu1 %v1495_v2 }
 0x448   :  { %v1467_v60 = vpop.eup %1466 }
 0x449   :  { %v625_v61 = vmul.f32 %v1467_v60, %v1463_v53 }
 0x44b   :  { %1418 = vmatmul.mubr.msk.f32.vlgmr.msra.gmra.mrb[6].mxu1 %vm62_vm11, %v625_v61 }
 0x44c   :  { %1426 = vmatpush3.msk.msra.mxu1 %vm148_vm12, %v1552_v21  ;;  %1427 = vmatprep.mubr.msk.f32.mxu1 %vm1496_vm1, %v1495_v2 }
 0x44d   :  { %1435 = vmatprep.subr.mxu1 %v1495_v2 }
 0x44f   :  { %1428 = vmatmul.mubr.msk.f32.vlgmr.msra.gmra.mrb[8].mxu1 %vm144_vm13, %v734_v14 }
 0x450   :  { %1437 = vmatprep.mubr.msk.f32.mxu1 %vm1496_vm1, %v1495_v2 }
 0x4aa   :  { %v532_v62 = vpop.f32.mrb[4].mxu1 }
 0x4ab   :  { %v1409_v63 = vpop.f32.mrb[5].mxu1 }
 0x51e   :  { %v699_v0 = vpop.f32.mrb[6].mxu1 }
 0x51f   :  { %704 = vrot.lane.b32.xlu1 %v699_v0, %s1498_s28  ;;  %v1419_v3 = vpop.f32.mrb[7].mxu1 }
 0x522   :  { %v877_v1 = vpop.f32.mrb[8].mxu1 }
 0x523   :  { %1436 = vmatpush3.xpose.msk.msra.mxu1 %vm370_vm14, %v877_v1 }
 0x524   :  { %1445 = vmatprep.subr.mxu1 %v1495_v2 }
 0x591   :  { %v705_v4 = vpop.permute.xlu1 %704 }
 0x592   :  { %v707_v6 = vsel %vm370_vm14, %v532_v62, %v705_v4 }
 0x593   :  { %v708_v7 = vadd.f32 %v707_v6, %v1565_v27  ;;  %v1429_v27 = vpop.f32.mrb[9].mxu1 }
 0x595   :  { %v710_v8 = vsel %vm709_vm0, %v708_v7, 0.0 }
 0x596   :  { %711 = vadd.xlane.f32.xlu1 %v710_v8 }
 0x623   :  { %v712_v9 = vpop.xlane.xlu1 %711 }
 0x624   :  { %v714_v10 = vmul.f32 0.16666667, %v712_v9 }
 0x626   :  { %v715_v11 = vsub.f32 %v708_v7, %v714_v10 }
 0x628   :  { %v716_v12 = vmul.f32 %v715_v11, %v715_v11 }
 0x62a   :  { %v717_v13 = vsel %vm709_vm0, %v716_v12, 0.0 }
 0x62b   :  { %718 = vadd.xlane.f32.xlu0 %v717_v13 }
 0x641   :  { %1119 = vrot.lane.b32.xlu0 %v877_v1, %s1497_s27 }
 0x6b8   :  { %v719_v15 = vpop.xlane.xlu0 %718 }
 0x6b9   :  { %v720_v16 = vmul.f32 0.16666667, %v719_v15 }
 0x6bb   :  { %v721_v17 = vadd.f32 1e-05, %v720_v16 }
 0x6bc   :  { %v1120_v5 = vpop.permute.xlu0 %1119 }
 0x6bd   :  { %1468 = vrsqrt.f32 %v721_v17 }
 0x6c7   :  { %v1469_v21 = vpop.eup %1468 }
 0x6c8   :  { %v723_v22 = vmul.f32 %v1469_v21, %v715_v11 }
 0x6ca   :  { %v728_v24 = vmul.f32 %v1628_v20, %v723_v22 }
 0x6cc   :  { %v1637_v25 = vadd.f32 %v1633_v23, %v728_v24 }
 0x6ce   :  { %1423 = vmatmul.mubr.msk.f32.vlgmr.msra.gmra.mrb[8].mxu0 %vm144_vm13, %v1637_v25 }
 0x6cf   :  { %1431 = vmatpush3.msk.msra.mxu0 %vm148_vm12, %v297_v26  ;;  %1432 = vmatprep.mubr.msk.f32.mxu0 %vm1496_vm1, %v1495_v2 }
 0x6d0   :  { %1440 = vmatprep.subr.mxu0 %v1495_v2 }
 0x6d2   :  { %1433 = vmatmul.mubr.msk.f32.vlgmr.msra.gmra.mrb[10].mxu0 %vm144_vm13, %v734_v14 }
 0x6d3   :  { %1442 = vmatprep.mubr.msk.f32.mxu0 %vm1496_vm1, %v1495_v2 }
 0x7a1   :  { %v804_v26 = vpop.f32.mrb[8].mxu0 }
 0x7a2   :  { %1117 = vrot.lane.b32.xlu0 %v804_v26, %s1497_s27  ;;  %v1424_v28 = vpop.f32.mrb[9].mxu0  ;;  %1438 = vmatmul.mubr.msk.f32.vlgmr.msra.gmra.mrb[10].mxu1 %vm370_vm14, %v804_v26 }
 0x7a3   :  { %1446 = vmatpush3.xpose.msk.msra.mxu1 %vm370_vm14, %v1120_v5  ;;  %1447 = vmatprep.mubr.msk.f32.mxu1 %vm1496_vm1, %v1495_v2 }
 0x7a5   :  { %v947_v43 = vpop.f32.mrb[10].mxu0 }
 0x7a6   :  { %v1434_v44 = vpop.f32.mrb[11].mxu0  ;;  %1441 = vmatpush3.msk.msra.mxu0 %vm60_vm10, %v947_v43 }
 0x7a7   :  { %1450 = vmatprep.subr.mxu0 %v1495_v2 }
 0x814   :  { %v1118_v29 = vpop.permute.xlu0 %1117 }
 0x815   :  { %1448 = vmatmul.mubr.msk.f32.vlgmr.msra.gmra.mrb[12].mxu1 %vm370_vm14, %v1118_v29 }
 0x875   :  { %v1023_v30 = vpop.f32.mrb[10].mxu1 }
 0x876   :  { %v1027_v31 = vmul.f32 0.57735026, %v1023_v30  ;;  %v1439_v32 = vpop.f32.mrb[11].mxu1 }
 0x878   :  { %v1029_v33 = vsel %vm1028_vm2, %v1027_v31, -inf }
 0x879   :  { %1030 = vmax.xlane.f32.xlu0 %v1029_v33 }
 0x8e8   :  { %v1191_v34 = vpop.f32.mrb[12].mxu1 }
 0x8e9   :  { %v1195_v35 = vmul.f32 0.57735026, %v1191_v34  ;;  %v1449_v36 = vpop.f32.mrb[13].mxu1 }
 0x8eb   :  { %v1196_v37 = vsel %vm1028_vm2, %v1195_v35, -inf }
 0x8ec   :  { %1197 = vmax.xlane.f32.xlu1 %v1196_v37 }
 0x906   :  { %v1031_v38 = vpop.xlane.xlu0 %1030 }
 0x907   :  { %v1032_v39 = vsub.f32 %v1027_v31, %v1031_v38 }
 0x909   :  { %v1033_v40 = vmul.f32 1.442695, %v1032_v39 }
 0x90b   :  { %1470 = vpow2.f32 %v1033_v40 }
 0x915   :  { %v1471_v41 = vpop.eup %1470 }
 0x916   :  { %v1035_v42 = vsel %vm1028_vm2, %v1471_v41, 0.0 }
 0x917   :  { %1036 = vadd.xlane.f32.xlu1 %v1035_v42 }
 0x979   :  { %v1198_v45 = vpop.xlane.xlu1 %1197 }
 0x97a   :  { %v1199_v46 = vsub.f32 %v1195_v35, %v1198_v45 }
 0x97c   :  { %v1200_v47 = vmul.f32 1.442695, %v1199_v46 }
 0x97e   :  { %1472 = vpow2.f32 %v1200_v47 }
 0x988   :  { %v1473_v48 = vpop.eup %1472 }
 0x989   :  { %v1202_v49 = vsel %vm1028_vm2, %v1473_v48, 0.0 }
 0x98a   :  { %1203 = vadd.xlane.f32.xlu1 %v1202_v49 }
 0x99b   :  { %1207 = vrot.lane.b32.xlu1 %v947_v43, %s1497_s27 }
 0x9a4   :  { %v1037_v50 = vpop.xlane.xlu1 %1036 }
 0x9a5   :  { %1474 = vrcp.f32 %v1037_v50 }
 0x9af   :  { %v1475_v51 = vpop.eup %1474 }
 0x9b0   :  { %v1039_v52 = vmul.f32 %v1475_v51, %v1471_v41 }
 0x9b2   :  { %1443 = vmatmul.mubr.msk.f32.vlgmr.msra.gmra.mrb[12].mxu0 %vm1040_vm3, %v1039_v52 }
 0x9b3   :  { %1452 = vmatprep.mubr.msk.f32.mxu0 %vm1496_vm1, %v1495_v2 }
 0xa17   :  { %v1204_v53 = vpop.xlane.xlu1 %1203 }
 0xa18   :  { %1476 = vrcp.f32 %v1204_v53 }
 0xa1b   :  { %v1208_v54 = vpop.permute.xlu1 %1207 }
 0xa1c   :  { %1451 = vmatpush3.msk.msra.mxu0 %vm60_vm10, %v1208_v54 }
 0xa22   :  { %v1477_v55 = vpop.eup %1476 }
 0xa23   :  { %v1206_v56 = vmul.f32 %v1477_v55, %v1473_v48 }
 0xa25   :  { %1453 = vmatmul.mubr.msk.f32.vlgmr.msra.gmra.mrb[14].mxu0 %vm1040_vm3, %v1206_v56 }
 0xa85   :  { %v1113_v57 = vpop.f32.mrb[12].mxu0 }
 0xa86   :  { %v1444_v58 = vpop.f32.mrb[13].mxu0 }
 0xaf8   :  { %v1280_v59 = vpop.f32.mrb[14].mxu0 }
 0xaf9   :  { %1285 = vrot.lane.b32.xlu1 %v1280_v59, %s1498_s28  ;;  %v1454_v60 = vpop.f32.mrb[15].mxu0 }
 0xb6b   :  { %v1286_v61 = vpop.permute.xlu1 %1285 }
 0xb6c   :  { %v1288_v62 = vsel %vm370_vm14, %v1113_v57, %v1286_v61 }
 0xb6d   :  { %v1289_v63 = vadd.f32 %v1288_v62, %v1637_v25 }
 0xb6f   :  { %v1290_v2 = vsel %vm709_vm0, %v1289_v63, 0.0 }
 0xb70   :  { %1291 = vadd.xlane.f32.xlu0 %v1290_v2 }
 0xbfd   :  { %v1292_v0 = vpop.xlane.xlu0 %1291 }
 0xbfe   :  { %v1293_v3 = vmul.f32 0.16666667, %v1292_v0 }
 0xc00   :  { %v1294_v4 = vsub.f32 %v1289_v63, %v1293_v3 }
 0xc02   :  { %v1295_v6 = vmul.f32 %v1294_v4, %v1294_v4 }
 0xc04   :  { %v1296_v7 = vsel %vm709_vm0, %v1295_v6, 0.0 }
 0xc05   :  { %1297 = vadd.xlane.f32.xlu1 %v1296_v7 }
 0xc92   :  { %v1298_v8 = vpop.xlane.xlu1 %1297 }
 0xc93   :  { %v1299_v9 = vmul.f32 0.16666667, %v1298_v8 }
 0xc95   :  { %v1300_v10 = vadd.f32 1e-05, %v1299_v9 }
 0xc97   :  { %1478 = vrsqrt.f32 %v1300_v10 }
 0xca1   :  { %v1479_v11 = vpop.eup %1478 }
 0xca2   :  { %v1302_v12 = vmul.f32 %v1479_v11, %v1294_v4 }
 0xca4   :  { %v1303_v13 = vmul.f32 %v1302_v12, %v1628_v20 }
 0xca6   :  { %v1304_v14 = vadd.f32 %v1633_v23, %v1303_v13 }
 0xca8   :  { %1305 = vst.msk [vmem:[%s1683_s3] sm:$0x1f] %vm709_vm0, %v1304_v14 }

</bundles_post_ra>
